<compile_context>
chip_gen: v6e
topology: v6e:2x2x1
jax: 0.10.0
libtpu: 0.0.40
codegen_flags: <defaults>
</compile_context>

<pallas_src>
import math
import functools

import jax
import jax.numpy as jnp
from jax import lax
from jax.experimental import pallas as pl
from jax.experimental.pallas import tpu as pltpu


def _round_up(a, b):
    return -(-a // b) * b


# Contract the K (lane) dim of x [tm, tk] with the K dim of W [tn, tk].
_DOT_DIMS = (((1,), (1,)), ((), ()))


# --------------------------------------------------------------------------
# Kernels
# --------------------------------------------------------------------------
def _kernel_fused(x_ref, w_ref, b_ref, o_ref, *, wscale):
    """2-D grid (reduction collapsed):  o = wscale * (x @ W^T) + b."""
    acc = lax.dot_general(x_ref[...], w_ref[...], dimension_numbers=_DOT_DIMS,
                          preferred_element_type=jnp.float32)
    o_ref[...] = (acc * wscale + b_ref[...]).astype(o_ref.dtype)


def _kernel_ksplit_acc(x_ref, w_ref, b_ref, o_ref, acc_ref, *, wscale):
    """3-D grid, f32 scratch accumulator (non-f32 outputs)."""
    k = pl.program_id(2)

    @pl.when(k == 0)
    def _():
        acc_ref[...] = jnp.zeros_like(acc_ref)

    acc_ref[...] += lax.dot_general(x_ref[...], w_ref[...],
                                    dimension_numbers=_DOT_DIMS,
                                    preferred_element_type=jnp.float32)

    @pl.when(k == pl.num_programs(2) - 1)
    def _():
        o_ref[...] = (acc_ref[...] * wscale + b_ref[...]).astype(o_ref.dtype)


def _kernel_ksplit_f32out(x_ref, w_ref, b_ref, o_ref, *, wscale):
    """3-D grid, accumulate directly into the resident f32 output block."""
    k = pl.program_id(2)

    @pl.when(k == 0)
    def _():
        o_ref[...] = jnp.zeros_like(o_ref)

    o_ref[...] += lax.dot_general(x_ref[...], w_ref[...],
                                  dimension_numbers=_DOT_DIMS,
                                  preferred_element_type=jnp.float32)

    @pl.when(k == pl.num_programs(2) - 1)
    def _():
        o_ref[...] = o_ref[...] * wscale + b_ref[...]


# --------------------------------------------------------------------------
# Hardware queries (with safe fallbacks)
# --------------------------------------------------------------------------
def _vmem_capacity_bytes():
    try:
        cap = getattr(pltpu.get_tpu_info(), "vmem_capacity_bytes", None)
        if cap:
            return int(cap)
    except Exception:
        pass
    return 64 << 20          # conservative default (v7x per-TC VMEM)


def _detect_num_tensorcores():
    try:
        return int(getattr(jax.devices()[0], "num_cores", 1) or 1)
    except Exception:
        return 1


# --------------------------------------------------------------------------
# Tile selection
# --------------------------------------------------------------------------
def _choose_tiles(M, N, K, xbytes, wbytes, obytes, budget):
    """Pick padded dims + tiles so that each grid step streams a large slab of
    W, the reduction axis is collapsed whenever the tiles fit the VMEM budget,
    and every block dim is a 128-multiple or equal to the full dim."""
    N_p = _round_up(N, 128)

    # rows (tm): small batch -> one resident M block; large M -> 256/512.
    if M <= 256:
        tm, M_p = M, M
    else:
        tm = 512 if M >= 2048 else 256
        while tm > 128 and _round_up(M, tm) > (M * 9) // 8:   # limit row padding
            tm //= 2
        M_p = _round_up(M, tm)

    def footprint(tn, tk, split_k):
        f = 2 * (tm * tk * xbytes + tn * tk * wbytes + tm * tn * obytes)
        f += 2 * tn * 4                      # bias tile (f32)
        if split_k:
            f += tm * tn * 4                 # worst case: f32 accumulator scratch
        return f

    # reduction (tk): collapse K entirely when the tiles fit.
    if footprint(128, K, False) <= budget:
        tk, K_p, split_k = K, K, False
    else:
        split_k = True
        tk = max(128, (min(_round_up(K, 128), 4096) // 128) * 128)
        while tk > 128 and footprint(128, tk, True) > budget:
            tk = max(128, (tk // 2 // 128) * 128)
        K_p = _round_up(K, tk)

    # columns (tn): largest 128-multiple (<=1024) fitting the budget with
    # modest padding waste.
    tn = max(128, (min(N_p, 1024) // 128) * 128)
    while tn > 128 and (footprint(tn, tk, split_k) > budget
                        or _round_up(N_p, tn) > max(N_p, (N_p * 5) // 4)):
        tn -= 128
    N_p = _round_up(N_p, tn)

    return M_p, N_p, K_p, tm, tn, tk, split_k


# --------------------------------------------------------------------------
# Public wrapper
# --------------------------------------------------------------------------
def equalized_linear(x, weight, bias=None, *, gain=math.sqrt(2.0),
                     num_tensorcores=None, interpret=False):
    """Pallas TPU implementation of EqualizedLinear.forward.

    x:      [..., in_features]
    weight: [out_features, in_features]   (PyTorch nn.Linear layout)
    bias:   [out_features] (or None -> zeros)
    returns [..., out_features] == (x * wscale) @ weight.T + bias
    """
    orig_shape = x.shape
    K = orig_shape[-1]
    x2 = x.reshape(-1, K)
    M = x2.shape[0]
    N, K2 = weight.shape
    assert K == K2, "in_features mismatch"
    if bias is None:
        bias = jnp.zeros((N,), x.dtype)
    wscale = float(gain) / math.sqrt(K)      # std = gain / sqrt(fan_in)

    out_dtype = x.dtype
    xbytes = jnp.dtype(x.dtype).itemsize
    wbytes = jnp.dtype(weight.dtype).itemsize
    obytes = jnp.dtype(out_dtype).itemsize

    # Per-chip VMEM budget (v7x: 64 MiB/TC; v5e/v6e: 128 MiB).
    cap = _vmem_capacity_bytes()
    budget = max(8 << 20, min(cap // 2 - (4 << 20), 60 << 20))

    M_p, N_p, K_p, tm, tn, tk, split_k = _choose_tiles(
        M, N, K, xbytes, wbytes, obytes, budget)

    # v7x only: keep an even number of parallel blocks so both TCs stay busy.
    # Never fires on single-TC v5e/v6e; never drops tn below 256.
    if num_tensorcores is None:
        num_tensorcores = _detect_num_tensorcores()
    if num_tensorcores >= 2:
        n_par = (M_p // tm) * (N_p // tn)
        if n_par % 2 == 1 and tn >= 512 and tn % 256 == 0:
            tn //= 2

    # Zero padding is exact: padded K contributes 0 to the contraction,
    # padded M rows / N columns are sliced off the result.
    x_p = x2 if (M_p == M and K_p == K) else jnp.pad(x2, ((0, M_p - M), (0, K_p - K)))
    w_p = weight if (N_p == N and K_p == K) else jnp.pad(
        weight, ((0, N_p - N), (0, K_p - K)))
    b_p = bias if N_p == N else jnp.pad(bias, (0, N_p - N))
    b2 = b_p.reshape(1, N_p).astype(jnp.float32)

    cost = pl.CostEstimate(
        flops=2 * M * N * K,
        transcendentals=0,
        bytes_accessed=(x_p.size * xbytes + w_p.size * wbytes
                        + b2.size * 4 + M_p * N_p * obytes),
    )
    compiler_params = pltpu.CompilerParams(
        dimension_semantics=(("parallel", "parallel") if not split_k
                             else ("parallel", "parallel", "arbitrary")),
        vmem_limit_bytes=int(min(cap - (8 << 20), budget + (16 << 20))),
    )

    if not split_k:
        grid = (M_p // tm, N_p // tn)
        in_specs = [
            pl.BlockSpec((tm, K_p), lambda i, j: (i, 0)),    # x tile
            pl.BlockSpec((tn, K_p), lambda i, j: (j, 0)),    # W tile [N, K]
            pl.BlockSpec((1, tn), lambda i, j: (0, j)),      # bias tile
        ]
        out_spec = pl.BlockSpec((tm, tn), lambda i, j: (i, j))
        kernel = functools.partial(_kernel_fused, wscale=wscale)
        scratch = []
    else:
        grid = (M_p // tm, N_p // tn, K_p // tk)
        in_specs = [
            pl.BlockSpec((tm, tk), lambda i, j, k: (i, k)),
            pl.BlockSpec((tn, tk), lambda i, j, k: (j, k)),
            pl.BlockSpec((1, tn), lambda i, j, k: (0, j)),
        ]
        out_spec = pl.BlockSpec((tm, tn), lambda i, j, k: (i, j))
        if jnp.dtype(out_dtype) == jnp.dtype(jnp.float32):
            kernel = functools.partial(_kernel_ksplit_f32out, wscale=wscale)
            scratch = []
        else:
            kernel = functools.partial(_kernel_ksplit_acc, wscale=wscale)
            scratch = [pltpu.VMEM((tm, tn), jnp.float32)]

    out = pl.pallas_call(
        kernel,
        out_shape=jax.ShapeDtypeStruct((M_p, N_p), out_dtype),
        grid_spec=pltpu.PrefetchScalarGridSpec(
            num_scalar_prefetch=0,
            grid=grid,
            in_specs=in_specs,
            out_specs=out_spec,
            scratch_shapes=scratch,
        ),
        compiler_params=compiler_params,
        cost_estimate=cost,
        interpret=interpret,
    )(x_p, w_p, b2)

    if M_p != M or N_p != N:
        out = out[:M, :N]
    return out.reshape(*orig_shape[:-1], N)


if __name__ == "__main__":
    key = jax.random.PRNGKey(0)
    k_x, k_w = jax.random.split(key)

    batch = 8
    in_features = 32
    out_features = 64
    gain = math.sqrt(2.0)

    # Parameter init matching the module's __init__:
    #   weight ~ N(0, 1), bias = 0 (init_bias_zero=True)
    weight = jax.random.normal(k_w, (out_features, in_features), jnp.float32)
    bias = jnp.zeros((out_features,), jnp.float32)

    x = jax.random.normal(k_x, (batch, in_features), jnp.float32)

    out = equalized_linear(x, weight, bias, gain=gain)
    out = jax.block_until_ready(out)

    # Pure-JAX reference of the PyTorch forward.
    wscale = gain / math.sqrt(in_features)
    ref = (x * wscale) @ weight.T + bias

    assert out.shape == (batch, out_features)
    assert jnp.allclose(out, ref, atol=1e-5, rtol=1e-5), "mismatch vs reference"
    print("KERNEL_OK")
</pallas_src>

<mosaic_0001>
module attributes {stable_mosaic.version = 11 : i64} {
  func.func @_kernel_fused(%arg0: i32, %arg1: i32, %arg2: memref<8x32xf32, #tpu.memory_space<vmem>>, %arg3: memref<128x32xf32, #tpu.memory_space<vmem>>, %arg4: memref<1x128xf32, #tpu.memory_space<vmem>>, %arg5: memref<8x128xf32, #tpu.memory_space<vmem>>) attributes {dimension_semantics = [#tpu.dimension_semantics<parallel>, #tpu.dimension_semantics<parallel>], iteration_bounds = array<i64: 1, 1>, scalar_prefetch = 0 : i64, scratch_operands = 0 : i64, tpu.core_type = #tpu.core_type<tc>, window_params = [{transform_indices = @transform_0, window_bounds = array<i64: 8, 32>}, {transform_indices = @transform_1, window_bounds = array<i64: 128, 32>}, {transform_indices = @transform_2, window_bounds = array<i64: 1, 128>}, {transform_indices = @transform_3, window_bounds = array<i64: 8, 128>}]} {
    %c0 = arith.constant 0 : index
    %c0_0 = arith.constant 0 : index
    %0 = vector.load %arg2[%c0, %c0_0] : memref<8x32xf32, #tpu.memory_space<vmem>>, vector<8x32xf32>
    %c0_1 = arith.constant 0 : index
    %c0_2 = arith.constant 0 : index
    %1 = vector.load %arg3[%c0_1, %c0_2] : memref<128x32xf32, #tpu.memory_space<vmem>>, vector<128x32xf32>
    %cst = arith.constant dense<0.000000e+00> : vector<8x128xf32>
    %2 = tpu.matmul %0, %1, %cst {dimension_numbers = #tpu.dot_dimension_numbers<[1], [1], [0], [0], [0, 0, 1, 0], [], []>} : vector<8x32xf32>, vector<128x32xf32>, vector<8x128xf32> -> vector<8x128xf32>
    %cst_3 = arith.constant 2.500000e-01 : f32
    %3 = vector.broadcast %cst_3 : f32 to vector<8x128xf32>
    %4 = arith.mulf %2, %3 : vector<8x128xf32>
    %c0_4 = arith.constant 0 : index
    %c0_5 = arith.constant 0 : index
    %5 = vector.load %arg4[%c0_4, %c0_5] : memref<1x128xf32, #tpu.memory_space<vmem>>, vector<1x128xf32>
    %6 = vector.broadcast %5 : vector<1x128xf32> to vector<8x128xf32>
    %7 = arith.addf %4, %6 : vector<8x128xf32>
    %c0_6 = arith.constant 0 : index
    %c0_7 = arith.constant 0 : index
    %8 = vector.load %arg5[%c0_6, %c0_7] : memref<8x128xf32, #tpu.memory_space<vmem>>, vector<8x128xf32>
    tpu.vector_store %arg5[%c0_6, %c0_7], %7 {strides = array<i32>} : memref<8x128xf32, #tpu.memory_space<vmem>>, vector<8x128xf32>,
    return
  }
  func.func @transform_0(%arg0: i32, %arg1: i32) -> (i32, i32) {
    %c0_i32 = arith.constant 0 : i32
    %c0_i32_0 = arith.constant 0 : i32
    return %arg0, %c0_i32 : i32, i32
  }
  func.func @transform_1(%arg0: i32, %arg1: i32) -> (i32, i32) {
    %c0_i32 = arith.constant 0 : i32
    %c0_i32_0 = arith.constant 0 : i32
    return %arg1, %c0_i32 : i32, i32
  }
  func.func @transform_2(%arg0: i32, %arg1: i32) -> (i32, i32) {
    %c0_i32 = arith.constant 0 : i32
    %c0_i32_0 = arith.constant 0 : i32
    return %c0_i32, %arg1 : i32, i32
  }
  func.func @transform_3(%arg0: i32, %arg1: i32) -> (i32, i32) {
    %c0_i32 = arith.constant 0 : i32
    return %arg0, %arg1 : i32, i32
  }
}

</mosaic_0001>

<bundles_post_ra>
// kernel: tpu_custom_call.1
= control target key start
LH: loop header
LB: loop body
LE: loop exit
PB: predicated region body
PF: predicated region fallthrough
CT: control target
= control target key end

     0   :  { %vm32_vm0 = vcmask 261120   ;;  %v273_v1 = vmov 0.0   ;;  %vm274_vm1 = vmmov 0   ;;  %s370_s0 = inlined_call_operand.vmem [shape: f32[8,32], index: 0, kind: input, shape index: {}]   ;;  %s371_s1 = inlined_call_operand.vmem [shape: f32[128,32], index: 1, kind: input, shape index: {}]   ;;  %s372_s2 = inlined_call_operand.vmem [shape: f32[1,128], index: 2, kind: input, shape index: {}]   ;;  %s373_s3 = inlined_call_operand.hbm [shape: f32[8,128], index: 3, kind: output, shape index: {}]  }
   0x1   :  { %v31_v0 = vld [vmem:[%s371_s1 + $0x78] sm:$0xff]  ;;  %213 = vmatprep.subr.mxu0 %v273_v1  ;;  %245 = vmatprep.mubr.msk.f32.mxu0 %vm274_vm1, %v273_v1  ;;  %v30_v2 = vld [vmem:[%s371_s1 + $0x70] sm:$0xff] }
   0x2   :  { %214 = vmatpush3.xpose.msk.msra.mxu0 %vm32_vm0, %v31_v0 }
   0x3   :  { %215 = vmatprep.subr.mxu0 %v273_v1 }
   0x4   :  { %8 = vsyncpa [#allocation3], 0  ;;  %v29_v3 = vld [vmem:[%s371_s1 + $0x68] sm:$0xff]  ;;  %v28_v4 = vld [vmem:[%s371_s1 + $0x60] sm:$0xff]  ;;  %s275_s21 = smov [#allocation2]  }
   0x5   :  { %v27_v5 = vld [vmem:[%s371_s1 + $0x58] sm:$0xff]  ;;  %v26_v6 = vld [vmem:[%s371_s1 + $0x50] sm:$0xff]  ;;  %v25_v7 = vld [vmem:[%s371_s1 + $0x48] sm:$0xff]  ;;  %s170_s22 = sshll.u32 %s275_s21, 4  ;;  %s171_s22 = int_to_ptr.vmem [resolvable:$true] %s170_s22 }
   0x6   :  { %216 = vmatpush3.xpose.msk.msra.mxu0 %vm32_vm0, %v30_v2  ;;  %v24_v8 = vld [vmem:[%s371_s1 + $0x40] sm:$0xff]  ;;  %v23_v9 = vld [vmem:[%s371_s1 + $0x38] sm:$0xff]  ;;  %v22_v10 = vld [vmem:[%s371_s1 + $0x30] sm:$0xff]  ;;  %p256_p1 = scmp.lt.s32.totalorder %s171_s22, %s171_s22 }
   0x7   :  { %217 = vmatprep.subr.mxu0 %v273_v1  ;;  %v21_v11 = vld [vmem:[%s371_s1 + $0x28] sm:$0xff]  ;;  %v20_v12 = vld [vmem:[%s371_s1 + $0x20] sm:$0xff]  ;;  %v19_v13 = vld [vmem:[%s371_s1 + $0x18] sm:$0xff] }
   0x8   :  { %v18_v14 = vld [vmem:[%s371_s1 + $0x10] sm:$0xff]  ;;  %v17_v15 = vld [vmem:[%s371_s1 + $0x8] sm:$0xff]  ;;  %v16_v16 = vld [vmem:[%s371_s1] sm:$0xff]  ;;  %s251_s1 = scalar_lea.vmem %s171_s22, 128 }
   0x9   :  { %v15_v17 = vld [vmem:[%s370_s0] sm:$0xff]  ;;  %p252_p0 = scmp.ne.s32.totalorder %s171_s22, %s251_s1  ;;  %p257_p2 = scmp.lt.s32.totalorder %s251_s1, %s251_s1 }
   0xa   :  { %218 = vmatpush3.xpose.msk.msra.mxu0 %vm32_vm0, %v29_v3  ;;  %v195_v19 = vld [vmem:[%s372_s2] ss:$0 sm:$0xff] }
   0xb   :  { %219 = vmatprep.subr.mxu0 %v273_v1  ;;  %p258_p3 = por %p257_p2, %p256_p1 }
   0xd   :  { %p259_p4 = pnand %p258_p3, %p252_p0 }
   0xe   :  { %220 = vmatpush3.xpose.msk.msra.mxu0 %vm32_vm0, %v28_v4 }
   0xf   :  { %221 = vmatprep.subr.mxu0 %v273_v1 }
  0x12   :  { %222 = vmatpush3.xpose.msk.msra.mxu0 %vm32_vm0, %v27_v5 }
  0x13   :  { %223 = vmatprep.subr.mxu0 %v273_v1 }
  0x16   :  { %224 = vmatpush3.xpose.msk.msra.mxu0 %vm32_vm0, %v26_v6 }
  0x17   :  { %225 = vmatprep.subr.mxu0 %v273_v1 }
  0x1a   :  { %226 = vmatpush3.xpose.msk.msra.mxu0 %vm32_vm0, %v25_v7 }
  0x1b   :  { %227 = vmatprep.subr.mxu0 %v273_v1 }
  0x1e   :  { %228 = vmatpush3.xpose.msk.msra.mxu0 %vm32_vm0, %v24_v8 }
  0x1f   :  { %229 = vmatprep.subr.mxu0 %v273_v1 }
  0x22   :  { %230 = vmatpush3.xpose.msk.msra.mxu0 %vm32_vm0, %v23_v9 }
  0x23   :  { %231 = vmatprep.subr.mxu0 %v273_v1 }
  0x26   :  { %232 = vmatpush3.xpose.msk.msra.mxu0 %vm32_vm0, %v22_v10 }
  0x27   :  { %233 = vmatprep.subr.mxu0 %v273_v1 }
  0x2a   :  { %234 = vmatpush3.xpose.msk.msra.mxu0 %vm32_vm0, %v21_v11 }
  0x2b   :  { %235 = vmatprep.subr.mxu0 %v273_v1 }
  0x2e   :  { %236 = vmatpush3.xpose.msk.msra.mxu0 %vm32_vm0, %v20_v12 }
  0x2f   :  { %237 = vmatprep.subr.mxu0 %v273_v1 }
  0x32   :  { %238 = vmatpush3.xpose.msk.msra.mxu0 %vm32_vm0, %v19_v13 }
  0x33   :  { %239 = vmatprep.subr.mxu0 %v273_v1 }
  0x36   :  { %240 = vmatpush3.xpose.msk.msra.mxu0 %vm32_vm0, %v18_v14 }
  0x37   :  { %241 = vmatprep.subr.mxu0 %v273_v1 }
  0x3a   :  { %242 = vmatpush3.xpose.msk.msra.mxu0 %vm32_vm0, %v17_v15 }
  0x3b   :  { %243 = vmatprep.subr.mxu0 %v273_v1 }
  0x3e   :  { %244 = vmatpush3.xpose.msk.msra.mxu0 %vm32_vm0, %v16_v16 }
  0x41   :  { %246 = vmatmul.mubr.msk.f32.vlgmr.msra.gmra.mxu0 %vm32_vm0, %v15_v17 }
 0x101   :  { %v150_v18 = vpop.f32.mrf.mxu0 }
 0x102   :  { %v154_v20 = vmul.f32 0.25, %v150_v18 }
 0x103   :  { %v247_v21 = vpop.f32.mrf.mxu0 }
 0x104   :  { %v162_v22 = vadd.f32 %v195_v19, %v154_v20 }
 0x106   :  { %163 = vst [vmem:[#allocation2] sm:$0xff] %v162_v22 }
 0x107   :  { %262 = shalt.err (!%p259_p4)
}
 0x108   :  { %173 = dma.vmem_to_hbm [thread:$0]  %s171_s22, 128, %s373_s3, [#allocation3]  }
 0x109   :  { %271 = dma.done.wait [#allocation3], 128  }
 0x10a   :  { %272 = vsyncadd [#allocation3], 4294967168 }
 0x10b   :  { %177 = vsyncpa [#allocation3], 1 }

</bundles_post_ra>
